<compile_context>
chip_gen: v7x
topology: tpu7x:2x2x1
jax: 0.10.0
libtpu: 0.0.40
codegen_flags: <defaults>
</compile_context>

<pallas_src>
import functools

import jax
import jax.numpy as jnp
from jax.experimental import pallas as pl
from jax.experimental.pallas import tpu as pltpu


def _neg_log_sigmoid(x):
    # -log(sigmoid(x)), numerically stable, one exp + one log1p per element (EUP).
    return jnp.log1p(jnp.exp(-jnp.abs(x))) + jnp.maximum(-x, 0.0)


def _pv_loss_kernel(emb_e_ref, pos_ref, neg_ref, out_ref, *, bsz, tb):
    """One batch tile (TB rows) per grid step.

    emb_e_ref: [TB, 1, D]   paragraph vectors (bf16)
    pos_ref:   [TB, Lp, D]  positive context-token embeddings (bf16)
    neg_ref:   [TB, Ln, D]  negative-sample embeddings (bf16; sign flip in-kernel)
    out_ref:   [1, 8, 128]  per-block partial loss sum (broadcast-filled)
    """
    b = pl.program_id(0)

    e = emb_e_ref[...]                     # (TB, 1, D)
    vp = pos_ref[...]                      # (TB, Lp, D)
    vn = neg_ref[...]                      # (TB, Ln, D)

    # Batched MXU contraction; scores land lane-dense as (TB, 1, L) in f32.
    s_p = jnp.einsum('bqd,bkd->bqk', e, vp, preferred_element_type=jnp.float32)
    s_n = jnp.einsum('bqd,bkd->bqk', e, vn, preferred_element_type=jnp.float32)

    nls_p = _neg_log_sigmoid(s_p)          # positives:  -log sigmoid(+e.v)
    nls_n = _neg_log_sigmoid(-s_n)         # negatives:  -log sigmoid(-e.v)

    # Per-row loss, then mask batch rows that were zero-padded up to a multiple
    # of TB.  (Padded token positions -- id 0 -- are deliberately kept, matching
    # the PyTorch reference.)
    row_loss = jnp.sum(nls_p, axis=2) + jnp.sum(nls_n, axis=2)      # (TB, 1)
    row = b * tb + jax.lax.broadcasted_iota(jnp.int32, (tb, 1), 0)
    partial = jnp.sum(jnp.where(row < bsz, row_loss, 0.0))

    out_ref[...] = jnp.broadcast_to(partial, out_ref.shape)


def _vmem_capacity_bytes():
    try:
        return int(pltpu.get_tpu_info().vmem_capacity_bytes)
    except Exception:
        return 128 * 1024 * 1024


def _vmem_limit_bytes():
    cap = _vmem_capacity_bytes()
    # v5e/v6e (128 MiB): 96 MiB; v7x (64 MiB): 56 MiB -- leave headroom for temps.
    return int(max(32 << 20, min(cap - (8 << 20), 96 << 20)))


def _choose_batch_tile(bsz, l_total, dpad, itemsize=2):
    """Pick TB rows/step from a generation-aware VMEM stream budget."""
    cap = _vmem_capacity_bytes()
    stream_budget = int(min(32 << 20, max(8 << 20, cap // 4)))
    # Double-buffered bf16 streams per row: (Lp + Ln + 1) * dpad * itemsize * 2.
    per_row = 2 * (l_total + 1) * dpad * itemsize
    tb = max(1, stream_budget // per_row)
    tb = min(tb, bsz)
    # Keep >= 2 grid blocks so dimension_semantics=("parallel",) can shard the
    # grid across both TensorCores on v7x (no effect on 1-TC v5e/v6e).
    if bsz >= 2:
        tb = min(tb, -(-bsz // 2))
    if tb >= 8:
        tb = (tb // 8) * 8                 # sublane-friendly score tiles
    tb = max(1, int(tb))
    num_blocks = -(-bsz // tb)
    return tb, num_blocks


def sample_negatives(rng_key, distribution, shape):
    """Weighted multinomial sampling with replacement via inverse-CDF buckets."""
    cdf = jnp.cumsum(distribution.astype(jnp.float32))
    u = jax.random.uniform(rng_key, shape, dtype=jnp.float32)
    idx = jnp.searchsorted(cdf, u, side='right')
    return jnp.clip(idx, 0, distribution.shape[0] - 1).astype(jnp.int32)


def paragraph_vector_dbow_loss(emb_e, tokens, emb_table, distribution,
                               *, n_neg=5, max_len=256, rng_key=None,
                               token_neg=None):
    """Matches ParagraphVectorDBOW.forward(emb_e, tokens) semantics."""
    bsz, pad_len = tokens.shape
    if pad_len > max_len:
        pad_len = max_len
        tokens = tokens[:, :pad_len]
    n_vocab, d = emb_table.shape

    lens = (tokens != 0).sum(axis=1)                       # [bsz]
    n_token = (n_neg + 1) * lens.sum()                     # scalar int

    lp = pad_len
    ln = pad_len * n_neg

    if token_neg is None:
        if rng_key is None:
            rng_key = jax.random.PRNGKey(0)
        # TODO(synk): weighted multinomial negative sampling stays in plain JAX
        # glue (inverse-CDF searchsorted); it has no clean in-kernel equivalent.
        token_neg = sample_negatives(rng_key, distribution, (bsz, ln))
    else:
        token_neg = token_neg[:, :ln]

    # Pad the embedding dimension once so every streamed block is lane-dense.
    dpad = max(128, ((d + 127) // 128) * 128)
    table_bf16 = emb_table.astype(jnp.bfloat16)
    e_bf16 = emb_e.astype(jnp.bfloat16)
    if dpad != d:
        table_bf16 = jnp.pad(table_bf16, ((0, 0), (0, dpad - d)))
        e_bf16 = jnp.pad(e_bf16, ((0, 0), (0, dpad - d)))

    # TODO(synk): the embedding-row gather stays in XLA; a fully fused in-kernel
    # gather (VMEM-resident table or DMA row-gather driven by scalar-prefetched
    # ids) would remove this [bsz, L, d] HBM write+re-read, but arbitrary-vocab
    # vectorized row-gather has no reliable Mosaic lowering and a per-token
    # scalar loop is slower than streaming at production L, so the gather output
    # is streamed as bf16 instead (halves the extra traffic).
    emb_v_pos = table_bf16[tokens]                         # [bsz, Lp, dpad] bf16
    emb_v_neg = table_bf16[token_neg]                      # [bsz, Ln, dpad] bf16
    emb_e3 = e_bf16[:, None, :]                            # [bsz, 1,  dpad] bf16

    tb, num_blocks = _choose_batch_tile(bsz, lp + ln, dpad)
    bsz_pad = num_blocks * tb
    if bsz_pad != bsz:
        pad = bsz_pad - bsz
        emb_e3 = jnp.pad(emb_e3, ((0, pad), (0, 0), (0, 0)))
        emb_v_pos = jnp.pad(emb_v_pos, ((0, pad), (0, 0), (0, 0)))
        emb_v_neg = jnp.pad(emb_v_neg, ((0, pad), (0, 0), (0, 0)))

    kernel = functools.partial(_pv_loss_kernel, bsz=bsz, tb=tb)

    partials = pl.pallas_call(
        kernel,
        out_shape=jax.ShapeDtypeStruct((num_blocks, 8, 128), jnp.float32),
        grid_spec=pltpu.PrefetchScalarGridSpec(
            num_scalar_prefetch=0,
            grid=(num_blocks,),
            in_specs=[
                pl.BlockSpec((tb, 1, dpad), lambda b: (b, 0, 0)),
                pl.BlockSpec((tb, lp, dpad), lambda b: (b, 0, 0)),
                pl.BlockSpec((tb, ln, dpad), lambda b: (b, 0, 0)),
            ],
            out_specs=pl.BlockSpec((1, 8, 128), lambda b: (b, 0, 0)),
        ),
        compiler_params=pltpu.CompilerParams(
            dimension_semantics=("parallel",),
            vmem_limit_bytes=_vmem_limit_bytes()),
    )(emb_e3, emb_v_pos, emb_v_neg)

    loss_sum = partials[:, 0, 0].sum()
    return loss_sum / n_token.astype(jnp.float32)


def _reference_loss(emb_e, tokens, token_neg, emb_table, n_neg):
    """Pure-JAX reference of the same forward pass (same bf16-rounded inputs)."""
    lens = (tokens != 0).sum(axis=1)
    n_token = (n_neg + 1) * lens.sum()
    table = emb_table.astype(jnp.bfloat16).astype(jnp.float32)
    e = emb_e.astype(jnp.bfloat16).astype(jnp.float32)
    emb_v = jnp.concatenate((table[tokens], -table[token_neg]), axis=1)
    dot = jnp.sum(e[:, None, :] * emb_v, axis=-1)
    return -jax.nn.log_sigmoid(dot).sum() / n_token.astype(jnp.float32)


if __name__ == "__main__":
    # small, deterministic synthetic setup
    n_vocab, d = 64, 128
    bsz, pad_len, n_neg = 4, 8, 5

    key = jax.random.PRNGKey(0)
    k_emb, k_e, k_tok, k_neg = jax.random.split(key, 4)

    # emb_term weight [n_vocab, d]
    emb_table = 0.1 * jax.random.normal(k_emb, (n_vocab, d), dtype=jnp.float32)

    # unigram^0.75 style distribution over the vocabulary
    counts = jnp.arange(1, n_vocab + 1, dtype=jnp.float32)
    distribution = counts ** 0.75
    distribution = distribution / distribution.sum()

    # paragraph vectors and padded token ids (0 == pad)
    emb_e = 0.1 * jax.random.normal(k_e, (bsz, d), dtype=jnp.float32)
    tokens = jax.random.randint(k_tok, (bsz, pad_len), 1, n_vocab)
    valid = jnp.arange(pad_len)[None, :] < (pad_len - (jnp.arange(bsz)[:, None] % 3))
    tokens = jnp.where(valid, tokens, 0).astype(jnp.int32)

    # sample negatives once so kernel and reference see identical inputs
    token_neg = sample_negatives(k_neg, distribution, (bsz, pad_len * n_neg))

    loss = paragraph_vector_dbow_loss(emb_e, tokens, emb_table, distribution,
                                      n_neg=n_neg, token_neg=token_neg)
    loss = jax.block_until_ready(loss)

    loss_ref = _reference_loss(emb_e, tokens, token_neg, emb_table, n_neg)
    loss_ref = jax.block_until_ready(loss_ref)

    if not jnp.allclose(loss, loss_ref, rtol=1e-4, atol=1e-5):
        raise AssertionError(f"mismatch: pallas={loss} ref={loss_ref}")

    print("KERNEL_OK")
</pallas_src>

<mosaic_0001>
module attributes {stable_mosaic.version = 11 : i64} {
  func.func @_pv_loss_kernel(%arg0: i32, %arg1: memref<2x1x128xbf16, #tpu.memory_space<vmem>>, %arg2: memref<2x8x128xbf16, #tpu.memory_space<vmem>>, %arg3: memref<2x40x128xbf16, #tpu.memory_space<vmem>>, %arg4: memref<1x8x128xf32, #tpu.memory_space<vmem>>) attributes {dimension_semantics = [#tpu.dimension_semantics<parallel>], iteration_bounds = array<i64: 2>, scalar_prefetch = 0 : i64, scratch_operands = 0 : i64, tpu.core_type = #tpu.core_type<tc>, window_params = [{transform_indices = @transform_0, window_bounds = array<i64: 2, 1, 128>}, {transform_indices = @transform_1, window_bounds = array<i64: 2, 8, 128>}, {transform_indices = @transform_2, window_bounds = array<i64: 2, 40, 128>}, {transform_indices = @transform_3, window_bounds = array<i64: 1, 8, 128>}]} {
    %c0 = arith.constant 0 : index
    %c0_0 = arith.constant 0 : index
    %c0_1 = arith.constant 0 : index
    %0 = vector.load %arg1[%c0, %c0_0, %c0_1] : memref<2x1x128xbf16, #tpu.memory_space<vmem>>, vector<2x1x128xbf16>
    %c0_2 = arith.constant 0 : index
    %c0_3 = arith.constant 0 : index
    %c0_4 = arith.constant 0 : index
    %1 = vector.load %arg2[%c0_2, %c0_3, %c0_4] : memref<2x8x128xbf16, #tpu.memory_space<vmem>>, vector<2x8x128xbf16>
    %c0_5 = arith.constant 0 : index
    %c0_6 = arith.constant 0 : index
    %c0_7 = arith.constant 0 : index
    %2 = vector.load %arg3[%c0_5, %c0_6, %c0_7] : memref<2x40x128xbf16, #tpu.memory_space<vmem>>, vector<2x40x128xbf16>
    "tpu.trace_start"() <{level = 10 : i32, message = "bqd,bkd->bqk"}> : () -> ()
    %cst = arith.constant dense<0.000000e+00> : vector<2x1x8xf32>
    %3 = tpu.matmul %0, %1, %cst {dimension_numbers = #tpu.dot_dimension_numbers<[2], [2], [1], [1], [0, 0, 0, 1, 1, 1], [0], [0]>} : vector<2x1x128xbf16>, vector<2x8x128xbf16>, vector<2x1x8xf32> -> vector<2x1x8xf32>
    %cst_8 = arith.constant dense<0.000000e+00> : vector<2x1x40xf32>
    %4 = tpu.matmul %0, %2, %cst_8 {dimension_numbers = #tpu.dot_dimension_numbers<[2], [2], [1], [1], [0, 0, 0, 1, 1, 1], [0], [0]>} : vector<2x1x128xbf16>, vector<2x40x128xbf16>, vector<2x1x40xf32> -> vector<2x1x40xf32>
    "tpu.trace_stop"() : () -> ()
    %5 = math.absf %3 : vector<2x1x8xf32>
    %cst_9 = arith.constant 0.000000e+00 : f32
    %6 = vector.broadcast %cst_9 : f32 to vector<2x1x8xf32>
    %7 = arith.subf %6, %5 : vector<2x1x8xf32>
    %8 = math.exp %7 : vector<2x1x8xf32>
    %9 = math.log1p %8 : vector<2x1x8xf32>
    %cst_10 = arith.constant 0.000000e+00 : f32
    %10 = vector.broadcast %cst_10 : f32 to vector<2x1x8xf32>
    %11 = arith.subf %10, %3 : vector<2x1x8xf32>
    %cst_11 = arith.constant 0.000000e+00 : f32
    %12 = vector.broadcast %cst_11 : f32 to vector<2x1x8xf32>
    %13 = arith.maximumf %11, %12 : vector<2x1x8xf32>
    %14 = arith.addf %9, %13 : vector<2x1x8xf32>
    %cst_12 = arith.constant 0.000000e+00 : f32
    %15 = vector.broadcast %cst_12 : f32 to vector<2x1x40xf32>
    %16 = arith.subf %15, %4 : vector<2x1x40xf32>
    %17 = math.absf %16 : vector<2x1x40xf32>
    %cst_13 = arith.constant 0.000000e+00 : f32
    %18 = vector.broadcast %cst_13 : f32 to vector<2x1x40xf32>
    %19 = arith.subf %18, %17 : vector<2x1x40xf32>
    %20 = math.exp %19 : vector<2x1x40xf32>
    %21 = math.log1p %20 : vector<2x1x40xf32>
    %cst_14 = arith.constant 0.000000e+00 : f32
    %22 = vector.broadcast %cst_14 : f32 to vector<2x1x40xf32>
    %23 = arith.subf %22, %16 : vector<2x1x40xf32>
    %cst_15 = arith.constant 0.000000e+00 : f32
    %24 = vector.broadcast %cst_15 : f32 to vector<2x1x40xf32>
    %25 = arith.maximumf %23, %24 : vector<2x1x40xf32>
    %26 = arith.addf %21, %25 : vector<2x1x40xf32>
    %cst_16 = arith.constant dense<0.000000e+00> : vector<2x1xf32>
    %27 = vector.multi_reduction <add>, %14, %cst_16 [2] : vector<2x1x8xf32> to vector<2x1xf32>
    %cst_17 = arith.constant dense<0.000000e+00> : vector<2x1xf32>
    %28 = vector.multi_reduction <add>, %26, %cst_17 [2] : vector<2x1x40xf32> to vector<2x1xf32>
    %29 = arith.addf %27, %28 : vector<2x1xf32>
    %c2_i32 = arith.constant 2 : i32
    %30 = arith.muli %arg0, %c2_i32 : i32
    %31 = tpu.iota {dimensions = array<i32: 0>} : vector<2x1xi32>
    %32 = vector.broadcast %30 : i32 to vector<2x1xi32>
    %33 = arith.addi %32, %31 : vector<2x1xi32>
    %c4_i32 = arith.constant 4 : i32
    %34 = vector.broadcast %c4_i32 : i32 to vector<2x1xi32>
    %35 = arith.cmpi slt, %33, %34 : vector<2x1xi32>
    %cst_18 = arith.constant 0.000000e+00 : f32
    %36 = vector.broadcast %cst_18 : f32 to vector<2x1xf32>
    %37 = arith.select %35, %29, %36 : vector<2x1xi1>, vector<2x1xf32>
    %38 = vector.shape_cast %37 : vector<2x1xf32> to vector<1x2x1xf32>
    %cst_19 = arith.constant dense<0.000000e+00> : vector<1xf32>
    %39 = vector.multi_reduction <add>, %38, %cst_19 [1, 2] : vector<1x2x1xf32> to vector<1xf32>
    %40 = vector.shape_cast %39 : vector<1xf32> to vector<1x1x1xf32>
    %41 = vector.extract %40[0, 0, 0] : f32 from vector<1x1x1xf32>
    %42 = vector.broadcast %41 : f32 to vector<1x8x128xf32>
    %c0_20 = arith.constant 0 : index
    %c0_21 = arith.constant 0 : index
    %c0_22 = arith.constant 0 : index
    %43 = vector.load %arg4[%c0_20, %c0_21, %c0_22] : memref<1x8x128xf32, #tpu.memory_space<vmem>>, vector<1x8x128xf32>
    tpu.vector_store %arg4[%c0_20, %c0_21, %c0_22], %42 {strides = array<i32>} : memref<1x8x128xf32, #tpu.memory_space<vmem>>, vector<1x8x128xf32>,
    return
  }
  func.func @transform_0(%arg0: i32) -> (i32, i32, i32) {
    %c0_i32 = arith.constant 0 : i32
    %c0_i32_0 = arith.constant 0 : i32
    %c0_i32_1 = arith.constant 0 : i32
    return %arg0, %c0_i32, %c0_i32_0 : i32, i32, i32
  }
  func.func @transform_1(%arg0: i32) -> (i32, i32, i32) {
    %c0_i32 = arith.constant 0 : i32
    %c0_i32_0 = arith.constant 0 : i32
    %c0_i32_1 = arith.constant 0 : i32
    return %arg0, %c0_i32, %c0_i32_0 : i32, i32, i32
  }
  func.func @transform_2(%arg0: i32) -> (i32, i32, i32) {
    %c0_i32 = arith.constant 0 : i32
    %c0_i32_0 = arith.constant 0 : i32
    %c0_i32_1 = arith.constant 0 : i32
    return %arg0, %c0_i32, %c0_i32_0 : i32, i32, i32
  }
  func.func @transform_3(%arg0: i32) -> (i32, i32, i32) {
    %c0_i32 = arith.constant 0 : i32
    %c0_i32_0 = arith.constant 0 : i32
    %c0_i32_1 = arith.constant 0 : i32
    return %arg0, %c0_i32, %c0_i32_0 : i32, i32, i32
  }
}

</mosaic_0001>

<bundles_post_ra>
// kernel: tpu_custom_call.1
= control target key start
LH: loop header
LB: loop body
LE: loop exit
PB: predicated region body
PF: predicated region fallthrough
CT: control target
= control target key end

     0   :  { %s1324_s0 = inlined_call_operand.hbm [shape: bf16[4,1,128], index: 0, kind: input, shape index: {}]   ;;  %s1325_s1 = inlined_call_operand.hbm [shape: bf16[4,8,128], index: 1, kind: input, shape index: {}]   ;;  %s1326_s2 = inlined_call_operand.hbm [shape: bf16[4,40,128], index: 2, kind: input, shape index: {}]   ;;  %s1327_s3 = inlined_call_operand.hbm [shape: f32[2,8,128], index: 3, kind: output, shape index: {}]  }
   0x1   :  { %1332 = sst [smem:[#allocation12_spill]] %s1324_s0 }
   0x2   :  { %8 = vsyncpa [#allocation3], 0 }
   0x3   :  { %10 = vsyncpa [#allocation3 + $0x1], 0 }
   0x4   :  { %11 = vsyncpa [#allocation6], 0 }
   0x5   :  { %13 = vsyncpa [#allocation6 + $0x1], 0 }
   0x6   :  { %14 = vsyncpa [#allocation4], 0 }
   0x7   :  { %16 = vsyncpa [#allocation4 + $0x1], 0  ;;  %s1066_s12 = smov 0   ;;  %s1068_s13 = smov 0  }
   0x8   :  { %s1070_s14 = smov 0   ;;  %s1072_s15 = smov 0  }
   0x9 LB: > { %s1087_s16 = sadd.s32 4294967295, %s1034_s15   ;;  %s712_s17 = sadd.s32 4294967294, %s1034_s15   ;;  %s1034_s15 = sphi %s1072_s15, %s1351_s15   ;;  %s1030_s14 = sphi %s1070_s14, %s1350_s14   ;;  %s1026_s13 = sphi %s1068_s13, %s1349_s13   ;;  %s1022_s12 = sphi %s1066_s12, %s1348_s12  }
   0xa   : > { %s1091_s18 = sadd.s32 1, %s1034_s15   ;;  %s29_s19 = sadd.s32 1, %s1030_s14 }
   0xb   : > { %s26_s20 = ssub.s32 %s1034_s15, %s1091_s18  ;;  %p36_p0 = scmp.ne.s32.totalorder %s1030_s14, %s1026_s13 }
   0xc   : > { %p27_p1 = scmp.eq.s32.totalorder %s26_s20, 0  ;;  %p37_p2 = scmp.eq.s32.totalorder %s1034_s15, 0 }
   0xd   : > { %p42_p3 = scmp.ne.s32.totalorder %s1026_s13, %s1022_s12  ;;  %p43_p4 = scmp.eq.s32.totalorder %s1087_s16, 0 }
   0xe   : > { %s1103_s21 = scalar_select %p27_p1, %s1030_s14, %s29_s19  }
   0xf   : > { %p38_p5 = por %p37_p2, %p36_p0  ;;  %p1105_p6 = por %p43_p4, %p42_p3 }
  0x10   : > { %p118_p7 = scmp.eq.s32.totalorder %s1087_s16, 1  ;;  %p124_p8 = scmp.eq.s32.totalorder %s712_s17, 1 }
  0x11   : > { %s1333_s22 = scalar_select %p1105_p6, 1, 0 }
  0x12   : > { %p812_p10 = scmp.lt.s32.totalorder %s1034_s15, 2  ;;  %p1112_p11 = por %p118_p7, %p36_p0 }
  0x13   : > { %p1116_p12 = por %p124_p8, %p42_p3  ;;  %s1121_s25 = sand.u32 1, %s1030_s14  }
  0x14   : > { %s1334_s23 = scalar_select %p1112_p11, 1, 0 }
  0x15   : > { %s1335_s24 = scalar_select %p1116_p12, 1, 0 }
  0x16   : > { %p1123_p13 = pnand %p812_p10, %p38_p5  ;;  %s165_s27 = sand.u32 1, %s1034_s15  }
  0x17   : > { %s718_s28 = sshll.u32 %s1121_s25, 3  ;;  %s740_s29 = sshll.u32 %s1034_s15, 7 }
  0x18   : > { %s1133_s5 = scalar_lea.hbm %s1325_s1, %s740_s29  ;;  %s169_s6 = scalar_lea.vmem [#allocation5], %s718_s28 }
  0x19   : > { %s176_s7 = sshll.u32 %s169_s6, 4  ;;  %s1138_s8 = scalar_lea.sflag [#allocation6], %s165_s27  ;;  %s1135_s7 = int_to_ptr.vmem [resolvable:$true] %s176_s7 }
  0x1a   : > { %s874_s9 = scalar_lea.hbm %s1133_s5, 128  ;;  %p1144_p2 = pneg %p1123_p13 }
  0x1b   : > { %p875_p1 = scmp.ne.s32.totalorder %s1133_s5, %s874_s9  ;;  %s879_s19 = scalar_lea.hbm %s1325_s1, 256 }
  0x1c   : > { %p880_p5 = scmp.lt.u32.totalorder %s1133_s5, %s1325_s1  ;;  %p881_p7 = scmp.lt.u32.totalorder %s879_s19, %s874_s9 }
  0x1d   : > { %p877_p3 = pnand %p1144_p2, %p875_p1  ;;  %p883_p10 = scmp.lt.u32.totalorder %s874_s9, %s1133_s5 }
  0x1e   : > { %p882_p8 = por %p881_p7, %p880_p5 }
  0x1f   : > { %p878_p4 = pneg %p877_p3 }
  0x20   : > { %p884_p9 = por %p883_p10, %p882_p8 }
  0x22   : > { %p885_p0 = pnand %p884_p9, %p878_p4 }
  0x24   : > { %888 = shalt.err (!%p885_p0)
}
  0x25   : > { %s889_s27 = scalar_lea.vmem %s1135_s7, 128  ;;  %s1036_s29 = smov [#allocation5]  }
  0x26   : > { %p890_p1 = scmp.ne.s32.totalorder %s1135_s7, %s889_s27  ;;  %s894_s30 = sshll.u32 %s1036_s29, 4  ;;  %s895_s30 = int_to_ptr.vmem [resolvable:$false] %s894_s30 }
  0x27   : > { %s896_s4 = scalar_lea.vmem %s895_s30, 256  ;;  %p897_p11 = scmp.lt.s32.totalorder %s1135_s7, %s895_s30 }
  0x28   : > { %p892_p3 = pnand %p890_p1, %p1144_p2  ;;  %p898_p6 = scmp.lt.s32.totalorder %s896_s4, %s889_s27 }
  0x2a   : > { %p893_p12 = pneg %p892_p3  ;;  %p899_p5 = por %p898_p6, %p897_p11 }
  0x2c   : > { %p900_p7 = pnand %p899_p5, %p893_p12 }
  0x2e   : > { %903 = shalt.err (!%p900_p7)
}
  0x2f   : > { %s1330_s6 = smov 64   ;;  %s1331_s9 = smov 4  }
  0x30   : > { %804 = dma.hbm_to_vmem [thread:$0]  (!%p1123_p13), %s1133_s5, 128, %s1135_s7, %s1138_s8, %s1330_s6, %s1330_s6, %s1331_s9  }
  0x31   : > { %p206_p6 = scmp.lt.s32.totalorder %s1034_s15, 3  ;;  %s715_s11 = sshll.u32 %s1121_s25, 1 }
  0x32   : > { %s739_s17 = sshll.u32 %s1034_s15, 5  ;;  %p1338_p9 = scmp.ge.s32.totalorder %s1034_s15, 1 }
  0x33   : > { %s1340_s0 = sld [smem:[#allocation12_spill]]  ;;  %s148_s29 = scalar_lea.vmem [#allocation2], %s715_s11 }
  0x34   : > { %p1176_p11 = pnand %p1338_p9, %p206_p6  ;;  %s155_s30 = sshll.u32 %s148_s29, 4  ;;  %s1185_s30 = int_to_ptr.vmem [resolvable:$true] %s155_s30 }
  0x35   : > { %s785_s5 = smul.u32 40, %s1121_s25  ;;  %s145_s7 = scalar_lea.sflag [#allocation3], %s1121_s25 }
  0x36   : > { %s1339_s19 = scalar_select %p1176_p11, 1, 0 }
  0x39   : > { %s1183_s27 = scalar_lea.hbm %s1340_s0, %s739_s17  ;;  %s909_s17 = scalar_lea.hbm %s1340_s0, 64 }
  0x3a   : > { %s904_s4 = scalar_lea.hbm %s1183_s27, 32  ;;  %p910_p8 = scmp.lt.u32.totalorder %s1183_s27, %s1340_s0 }
  0x3b   : > { %p905_p12 = scmp.ne.s32.totalorder %s1183_s27, %s904_s4  ;;  %p911_p10 = scmp.lt.u32.totalorder %s909_s17, %s904_s4 }
  0x3c   : > { %p913_p3 = scmp.lt.u32.totalorder %s904_s4, %s1183_s27 }
  0x3d   : > { %p907_p0 = pnand %p905_p12, %p1144_p2  ;;  %p912_p1 = por %p911_p10, %p910_p8 }
  0x3f   : > { %p908_p4 = pneg %p907_p0  ;;  %p914_p5 = por %p913_p3, %p912_p1 }
  0x41   : > { %p915_p7 = pnand %p914_p5, %p908_p4 }
  0x43   : > { %918 = shalt.err (!%p915_p7)
}
  0x44   : > { %s919_s11 = scalar_lea.vmem %s1185_s30, 32  ;;  %s1039_s6 = smov [#allocation2]  }
  0x45   : > { %p920_p6 = scmp.ne.s32.totalorder %s1185_s30, %s919_s11  ;;  %s924_s9 = sshll.u32 %s1039_s6, 4  ;;  %s925_s9 = int_to_ptr.vmem [resolvable:$false] %s924_s9 }
  0x46   : > { %s926_s29 = scalar_lea.vmem %s925_s9, 64  ;;  %p927_p0 = scmp.lt.s32.totalorder %s1185_s30, %s925_s9 }
  0x47   : > { %p922_p9 = pnand %p920_p6, %p1144_p2  ;;  %p928_p11 = scmp.lt.s32.totalorder %s926_s29, %s919_s11 }
  0x49   : > { %p923_p12 = pneg %p922_p9  ;;  %p929_p8 = por %p928_p11, %p927_p0 }
  0x4b   : > { %p930_p10 = pnand %p929_p8, %p923_p12 }
  0x4d   : > { %933 = shalt.err (!%p930_p10)
}
  0x4e   : > { %s1040_s4 = smov 16   ;;  %s1041_s17 = smov 1  }
  0x4f   : > { %801 = dma.hbm_to_vmem [thread:$0]  (!%p1123_p13), %s1183_s27, 32, %s1185_s30, %s145_s7, %s1040_s4, %s1040_s4, %s1041_s17  }
  0x50   : > { %s786_s20 = smul.u32 640, %s1034_s15  ;;  %s190_s28 = scalar_lea.vmem [#allocation7], %s785_s5 }
  0x51   : > { %s198_s6 = sshll.u32 %s190_s28, 4  ;;  %s939_s30 = scalar_lea.hbm %s1326_s2, 1280  ;;  %s1220_s6 = int_to_ptr.vmem [resolvable:$true] %s198_s6 }
  0x52   : > { %s1218_s29 = scalar_lea.hbm %s1326_s2, %s786_s20 }
  0x53   : > { %s934_s0 = scalar_lea.hbm %s1218_s29, 640  ;;  %p940_p3 = scmp.lt.u32.totalorder %s1218_s29, %s1326_s2 }
  0x54   : > { %p935_p11 = scmp.ne.s32.totalorder %s1218_s29, %s934_s0  ;;  %p941_p5 = scmp.lt.u32.totalorder %s939_s30, %s934_s0 }
  0x55   : > { %p943_p6 = scmp.lt.u32.totalorder %s934_s0, %s1218_s29 }
  0x56   : > { %p937_p4 = pnand %p935_p11, %p1144_p2  ;;  %p942_p7 = por %p941_p5, %p940_p3 }
  0x58   : > { %p938_p1 = pneg %p937_p4  ;;  %p944_p9 = por %p943_p6, %p942_p7 }
  0x5a   : > { %p945_p12 = pnand %p944_p9, %p938_p1 }
  0x5c   : > { %948 = shalt.err (!%p945_p12)
}
  0x5d   : > { %s949_s4 = scalar_lea.vmem %s1220_s6, 640  ;;  %s1042_s17 = smov [#allocation7]  }
  0x5e   : > { %p950_p0 = scmp.ne.s32.totalorder %s1220_s6, %s949_s4  ;;  %s954_s20 = sshll.u32 %s1042_s17, 4  ;;  %s955_s20 = int_to_ptr.vmem [resolvable:$false] %s954_s20 }
  0x5f   : > { %s956_s28 = scalar_lea.vmem %s955_s20, 1280  ;;  %p957_p11 = scmp.lt.s32.totalorder %s1220_s6, %s955_s20 }
  0x60   : > { %p952_p8 = pnand %p950_p0, %p1144_p2  ;;  %p958_p4 = scmp.lt.s32.totalorder %s956_s28, %s949_s4 }
  0x62   : > { %p953_p10 = pneg %p952_p8  ;;  %p959_p3 = por %p958_p4, %p957_p11 }
  0x64   : > { %p960_p5 = pnand %p959_p3, %p953_p10 }
  0x66   : > { %963 = shalt.err (!%p960_p5)
}
  0x67   : > { %s1341_s0 = smov 4   ;;  %s1342_s11 = smov 64  }
  0x68   : > { %807 = dma.hbm_to_vmem [thread:$0]  (!%p1123_p13), %s1218_s29, 640, %s1220_s6, %s1138_s8, %s1342_s11, %s1342_s11, %s1341_s0  }
  0x69   : > { %p1343_p2 = scmp.ne.s32.totalorder %s1339_s19, 0 }
  0x6a   : > { %s1250_s10 = sand.u32 (!%p1343_p2), 1, %s1026_s13   ;;  %p1344_p1 = scmp.ne.s32.totalorder (!%p1343_p2), %s1333_s22, 0 }
  0x6b   : > { %210 = sbr.rel (%p1343_p2) target bundleno = 771 (0x303), region = 32  ;;  %s725_s9 = sshll.u32 (!%p1343_p2), %s1250_s10, 1 }
  0x6c   : > { %s213_s27 = scalar_lea.sflag (!%p1343_p2), [#allocation3], %s1250_s10  ;;  %s216_s25 = scalar_lea.vmem (!%p1343_p2), [#allocation2], %s725_s9 }
  0x72   : > { %1009 = dma.done.wait (%p1344_p1), %s213_s27, 32  }
  0x73   : > { %1011 = vsyncadd (%p1344_p1), %s213_s27, 4294967264  ;;  %s221_s26 = sand.u32 1, %s1087_s16   ;;  %s726_s8 = sshll.u32 %s1250_s10, 3 }
  0x74   : > { %s222_s19 = scalar_lea.sflag [#allocation6], %s221_s26  ;;  %s225_s6 = scalar_lea.vmem [#allocation5], %s726_s8 }
  0x75   : > { %1013 = dma.done.wait (%p1344_p1), %s222_s19, 768  }
  0x76   : > { %1015 = vsyncadd (%p1344_p1), %s222_s19, 4294966528  ;;  %v1043_v0 = vmov 0.0   ;;  %vm1044_vm0 = vmmov 0   ;;  %s787_s29 = smul.u32 40, %s1250_s10  ;;  %v273_v1 = vld [vmem:[%s225_s6] sm:$0xf] }
  0x77   : > { %753 = vmatprep.subr.bf16.mxu0 %v1043_v0  ;;  %759 = vmatprep.subr.bf16.mxu1 %v1043_v0  ;;  %v274_v2 = vld [vmem:[%s225_s6 + $0x4] sm:$0xf]  ;;  %v271_v3 = vld [vmem:[%s216_s25] sm:$0x1]  ;;  %v272_v4 = vld [vmem:[%s216_s25 + $0x1] sm:$0x1] }
  0x78   : > { %755 = vmatprep.mubr.msk.bf16.mxu0 %vm1044_vm0, %v1043_v0  ;;  %761 = vmatprep.mubr.msk.bf16.mxu1 %vm1044_vm0, %v1043_v0  ;;  %s234_s30 = scalar_lea.vmem [#allocation7], %s787_s29  ;;  %vm543_vm1 = vcmask 57344   ;;  %vm550_vm6 = vcmask 319488   ;;  %s734_s22 = sshll.u32 %s1087_s16, 1  ;;  %vm568_vm7 = vcmask 1041409   ;;  %vm572_vm9 = vcmask 1024  }
  0x79   : > { %754 = vmatpush3.bf16.xpose.msra.mxu0 %v273_v1  ;;  %760 = vmatpush3.bf16.xpose.msra.mxu1 %v274_v2  ;;  %v852_v5 = vld [vmem:[%s234_s30] sm:$0xff]   ;;  %v853_v6 = vld [vmem:[%s234_s30 + $0x14] sm:$0xff]   ;;  %v854_v7 = vld [vmem:[%s234_s30 + $0x8] sm:$0xff]   ;;  %s266_s5 = scalar_lea.vmem [#allocation8], %s726_s8  ;;  %s736_s4 = sshll.u32 %s1087_s16, 7 }
  0x7a   : > { %765 = vmatprep.subr.bf16.mxu0 %v1043_v0  ;;  %775 = vmatprep.subr.bf16.mxu1 %v1043_v0  ;;  %v855_v8 = vld [vmem:[%s234_s30 + $0x1c] sm:$0xff]   ;;  %v856_v9 = vld [vmem:[%s234_s30 + $0x10] ss:$0 sps:$4 sm:$0xff]   ;;  %v857_v10 = vld [vmem:[%s234_s30 + $0x24] ss:$0 sps:$4 sm:$0xff]   ;;  %s599_s7 = sshll.u32 %s266_s5, 4  ;;  %s1282_s0 = scalar_lea.hbm %s1327_s3, %s736_s4  ;;  %s1277_s7 = int_to_ptr.vmem [resolvable:$true] %s599_s7 }
  0x7b   : > { %s586_s11 = scalar_lea.sflag [#allocation4], %s1250_s10  ;;  %s964_s9 = scalar_lea.vmem %s1277_s7, 128 }
  0x7c   : > { %p965_p13 = scmp.ne.s32.totalorder %s1277_s7, %s964_s9  ;;  %p1345_p7 = scmp.ne.s32.totalorder %s1334_s23, 0 }
  0x7d   : > { %s1045_s16 = smov [#allocation8]  }
  0x7e   : > { %p966_p6 = pnand %p965_p13, %p1345_p7  ;;  %s968_s27 = sshll.u32 %s1045_s16, 4  ;;  %s969_s27 = int_to_ptr.vmem [resolvable:$false] %s968_s27 }
  0x7f   : > { %s970_s25 = scalar_lea.vmem %s969_s27, 256  ;;  %p971_p12 = scmp.lt.s32.totalorder %s1277_s7, %s969_s27 }
  0x80   : > { %756 = vmatmul.mubr.bf16.vlgmr.msra.gmra.mrb[0].mxu0 %v271_v3  ;;  %762 = vmatmul.mubr.bf16.vlgmr.msra.gmra.mrb[0].mxu1 %v272_v4  ;;  %p967_p9 = pneg %p966_p6  ;;  %p972_p0 = scmp.lt.s32.totalorder %s970_s25, %s964_s9 }
  0x81   : > { %766 = vmatpush3.bf16.xpose.msra.mxu0 %v852_v5  ;;  %776 = vmatpush3.bf16.xpose.msra.mxu1 %v853_v6 }
  0x82   : > { %767 = vmatprep.subr.bf16.mxu0 %v1043_v0  ;;  %777 = vmatprep.subr.bf16.mxu1 %v1043_v0  ;;  %p973_p8 = por %p972_p0, %p971_p12 }
  0x83   : > { %771 = vmatprep.mubr.msk.bf16.mxu0 %vm1044_vm0, %v1043_v0  ;;  %781 = vmatprep.mubr.msk.bf16.mxu1 %vm1044_vm0, %v1043_v0 }
  0x84   : > { %p974_p10 = pnand %p973_p8, %p967_p9 }
  0x89   : > { %768 = vmatpush3.bf16.xpose.msra.mxu0 %v854_v7  ;;  %778 = vmatpush3.bf16.xpose.msra.mxu1 %v855_v8 }
  0x8a   : > { %769 = vmatprep.subr.bf16.mxu0 %v1043_v0  ;;  %779 = vmatprep.subr.bf16.mxu1 %v1043_v0 }
  0x91   : > { %770 = vmatpush3.bf16.xpose.msra.mxu0 %v856_v9  ;;  %780 = vmatpush3.bf16.xpose.msra.mxu1 %v857_v10 }
  0x98   : > { %772 = vmatmul.mubr.bf16.vlgmr.msra.gmra.mrb[4].mxu0 %v271_v3  ;;  %782 = vmatmul.mubr.bf16.vlgmr.msra.gmra.mrb[4].mxu1 %v272_v4 }
 0x153   : > { %v319_v11 = vpop.f32.mrb[0].mxu0  ;;  %v359_v12 = vpop.f32.mrb[0].mxu1 }
 0x154   : > { %v477_v13 = vand.u32 2147483647, %v319_v11  ;;  %v478_v14 = vand.u32 2147483647, %v359_v12  ;;  %v757_v15 = vpop.f32.mrb[1].mxu0  ;;  %v763_v16 = vpop.f32.mrb[1].mxu1 }
 0x155   : > { %v322_v19 = vpop.f32.mrb[2].mxu0  ;;  %v362_v20 = vpop.f32.mrb[2].mxu1  ;;  %v503_v42 = vsub.f32 0.0, %v319_v11  ;;  %v504_v47 = vsub.f32 0.0, %v359_v12 }
 0x156   : > { %v479_v17 = vsub.f32 0.0, %v477_v13  ;;  %v480_v18 = vsub.f32 0.0, %v478_v14  ;;  %v758_v21 = vpop.f32.mrb[3].mxu0  ;;  %v764_v22 = vpop.f32.mrb[3].mxu1 }
 0x157   : > { %v505_v57 = vmax.f32 %v503_v42, 0.0  ;;  %v506_v60 = vmax.f32 %v504_v47, 0.0 }
 0x158   : > { %v481_v23 = vmul.f32 1.442695, %v479_v17  ;;  %v483_v24 = vmul.f32 1.442695, %v480_v18 }
 0x15a   : > { %858 = vpow2.f32 %v481_v23 }
 0x15b   : > { %860 = vpow2.f32 %v483_v24 }
 0x164   : > { %v859_v25 = vpop.eup %858 }
 0x165   : > { %v861_v26 = vpop.eup %860  ;;  %v485_v27 = vadd.f32 1.0, %v859_v25  ;;  %v488_v29 = vmul.f32 -0.5, %v859_v25  ;;  %v491_v46 = vand.u32 2147483647, %v859_v25 }
 0x166   : > { %v494_v28 = vadd.f32 1.0, %v861_v26  ;;  %v497_v32 = vmul.f32 -0.5, %v861_v26  ;;  %v500_v50 = vand.u32 2147483647, %v861_v26 }
 0x167   : > { %862 = vlog2.f32 %v485_v27  ;;  %v489_v41 = vadd.f32 1.0, %v488_v29  ;;  %vm492_vm2 = vcmp.lt.f32.partialorder %v491_v46, 0.0004427343  ;;  %v560_v29 = vlaneseq }
 0x168   : > { %864 = vlog2.f32 %v494_v28  ;;  %v498_v45 = vadd.f32 1.0, %v497_v32  ;;  %vm501_vm3 = vcmp.lt.f32.partialorder %v500_v50, 0.0004427343 }
 0x169   : > { %v490_v56 = vmul.f32 %v859_v25, %v489_v41 }
 0x16a   : > { %v499_v59 = vmul.f32 %v861_v26, %v498_v45 }
 0x16b   : > { %v415_v30 = vpop.f32.mrb[4].mxu0  ;;  %v471_v31 = vpop.f32.mrb[4].mxu1 }
 0x16c   : > { %v509_v33 = vsub.f32 0.0, %v415_v30  ;;  %v510_v34 = vsub.f32 0.0, %v471_v31  ;;  %v773_v35 = vpop.f32.mrb[5].mxu0  ;;  %v783_v36 = vpop.f32.mrb[5].mxu1  ;;  %v561_v30 = vshrl.u32 %v560_v29, 7 }
 0x16d   : > { %v418_v37 = vpop.f32.mrb[6].mxu0  ;;  %v474_v38 = vpop.f32.mrb[6].mxu1 }
 0x16e   : > { %v511_v39 = vand.u32 2147483647, %v509_v33  ;;  %v512_v40 = vand.u32 2147483647, %v510_v34  ;;  %v774_v43 = vpop.f32.mrb[7].mxu0  ;;  %v784_v44 = vpop.f32.mrb[7].mxu1 }
 0x16f   : > { %v537_v10 = vsub.f32 0.0, %v509_v33  ;;  %v538_v13 = vsub.f32 0.0, %v510_v34  ;;  %v562_v33 = vstv %s734_s22 }
 0x170   : > { %v513_v48 = vsub.f32 0.0, %v511_v39  ;;  %v514_v49 = vsub.f32 0.0, %v512_v40  ;;  %v563_v34 = vadd.s32 %v562_v33, %v561_v30 }
 0x171   : > { %v863_v51 = vpop.eup %862  ;;  %v539_v19 = vmax.f32 %v537_v10, 0.0  ;;  %v540_v22 = vmax.f32 %v538_v13, 0.0 }
 0x172   : > { %v865_v52 = vpop.eup %864  ;;  %v515_v53 = vmul.f32 1.442695, %v513_v48  ;;  %v517_v54 = vmul.f32 1.442695, %v514_v49  ;;  %v487_v55 = vmul.f32 0.6931472, %v863_v51 }
 0x173   : > { %v496_v58 = vmul.f32 0.6931472, %v865_v52  ;;  %vm564_vm8 = vcmp.lt.s32.totalorder %v563_v34, 4 }
 0x174   : > { %866 = vpow2.f32 %v515_v53  ;;  %v493_v61 = vsel %vm492_vm2, %v490_v56, %v487_v55 }
 0x175   : > { %868 = vpow2.f32 %v517_v54  ;;  %v502_v62 = vsel %vm501_vm3, %v499_v59, %v496_v58  ;;  %v507_v63 = vadd.f32 %v505_v57, %v493_v61 }
 0x176   : > { %v508_v0 = vadd.f32 %v506_v60, %v502_v62 }
 0x177   : > { %v544_v1 = vsel %vm543_vm1, %v507_v63, 0.0 }
 0x178   : > { %v547_v2 = vsel %vm543_vm1, %v508_v0, 0.0  ;;  %545 = vadd.xlane.f32.xlu1 %v544_v1 }
 0x179   : > { %548 = vadd.xlane.f32.xlu0 %v547_v2 }
 0x17e   : > { %v867_v3 = vpop.eup %866 }
 0x17f   : > { %v869_v4 = vpop.eup %868  ;;  %v519_v5 = vadd.f32 1.0, %v867_v3  ;;  %v522_v7 = vmul.f32 -0.5, %v867_v3  ;;  %v525_v12 = vand.u32 2147483647, %v867_v3 }
 0x180   : > { %v528_v6 = vadd.f32 1.0, %v869_v4  ;;  %v531_v8 = vmul.f32 -0.5, %v869_v4  ;;  %v534_v14 = vand.u32 2147483647, %v869_v4 }
 0x181   : > { %870 = vlog2.f32 %v519_v5  ;;  %v523_v9 = vadd.f32 1.0, %v522_v7  ;;  %vm526_vm4 = vcmp.lt.f32.partialorder %v525_v12, 0.0004427343 }
 0x182   : > { %872 = vlog2.f32 %v528_v6  ;;  %v532_v11 = vadd.f32 1.0, %v531_v8  ;;  %vm535_vm5 = vcmp.lt.f32.partialorder %v534_v14, 0.0004427343 }
 0x183   : > { %v524_v18 = vmul.f32 %v867_v3, %v523_v9 }
 0x184   : > { %v533_v21 = vmul.f32 %v869_v4, %v532_v11 }
 0x18b   : > { %v871_v15 = vpop.eup %870 }
 0x18c   : > { %v873_v16 = vpop.eup %872  ;;  %v521_v17 = vmul.f32 0.6931472, %v871_v15 }
 0x18d   : > { %v530_v20 = vmul.f32 0.6931472, %v873_v16 }
 0x18e   : > { %v527_v23 = vsel %vm526_vm4, %v524_v18, %v521_v17 }
 0x18f   : > { %v536_v24 = vsel %vm535_vm5, %v533_v21, %v530_v20  ;;  %v541_v25 = vadd.f32 %v539_v19, %v527_v23 }
 0x190   : > { %v542_v26 = vadd.f32 %v540_v22, %v536_v24 }
 0x191   : > { %v551_v27 = vsel %vm550_vm6, %v541_v25, 0.0 }
 0x192   : > { %v554_v28 = vsel %vm550_vm6, %v542_v26, 0.0  ;;  %552 = vadd.xlane.f32.xlu1 %v551_v27 }
 0x193   : > { %555 = vadd.xlane.f32.xlu0 %v554_v28 }
 0x205   : > { %v546_v32 = vpop.xlane.xlu1 %545 }
 0x206   : > { %v549_v31 = vpop.xlane.xlu0 %548 }
 0x21f   : > { %v553_v36 = vpop.xlane.xlu1 %552 }
 0x220   : > { %v556_v35 = vpop.xlane.xlu0 %555  ;;  %v557_v39 = vadd.f32 %v553_v36, %v546_v32 }
 0x221   : > { %v558_v37 = vadd.f32 %v556_v35, %v549_v31 }
 0x223   : > { %v567_v38 = vrot.slane %v558_v37, 7 }
 0x225   : > { %v569_v40 = vsel %vm568_vm7, %v567_v38, %v557_v39 }
 0x226   : > { %v571_v41 = vsel %vm564_vm8, %v569_v40, 0.0 }
 0x227   : > { %v573_v42 = vsel %vm572_vm9, %v571_v41, 0.0 }
 0x228   : > { %574 = vadd.xlane.f32.xlu0 %v573_v42 }
 0x2b5   : > { %v575_v43 = vpop.xlane.xlu0 %574 }
 0x2b6   : > { %v576_v44 = vrot.slane %v575_v43, 4 }
 0x2b8   : > { %v577_v45 = vadd.f32 %v576_v44, %v575_v43 }
 0x2ba   : > { %v578_v46 = vrot.slane %v577_v45, 2 }
 0x2bc   : > { %v579_v47 = vadd.f32 %v578_v46, %v577_v45 }
 0x2be   : > { %v580_v48 = vrot.slane %v579_v47, 1 }
 0x2c0   : > { %v581_v49 = vadd.f32 %v580_v48, %v579_v47 }
 0x2c2   : > { %788 = vpush %v581_v49 }
 0x2f3   : > { %s789_s17 = spop %788 }
 0x2f4   : > { %v583_v50 = vstv %s789_s17 }
 0x2f5   : > { %584 = vst [vmem:[%s266_s5] sm:$0xff] %v583_v50 }
 0x2f6   : > { %977 = shalt.err (!%p974_p10)
}
 0x2f7   : > { %s978_s10 = scalar_lea.hbm %s1282_s0, 128  ;;  %s982_s19 = scalar_lea.hbm %s1327_s3, 256 }
 0x2f8   : > { %p979_p11 = scmp.ne.s32.totalorder %s1282_s0, %s978_s10  ;;  %p983_p5 = scmp.lt.u32.totalorder %s1282_s0, %s1327_s3 }
 0x2f9   : > { %p984_p2 = scmp.lt.u32.totalorder %s982_s19, %s978_s10  ;;  %p986_p13 = scmp.lt.u32.totalorder %s978_s10, %s1282_s0 }
 0x2fa   : > { %p980_p4 = pnand %p979_p11, %p1345_p7 }
 0x2fb   : > { %p985_p1 = por %p984_p2, %p983_p5 }
 0x2fc   : > { %p981_p3 = pneg %p980_p4 }
 0x2fd   : > { %p987_p6 = por %p986_p13, %p985_p1 }
 0x2ff   : > { %p988_p9 = pnand %p987_p6, %p981_p3 }
 0x301   : > { %991 = shalt.err (!%p988_p9)
}
 0x302   : > { %796 = dma.vmem_to_hbm [thread:$0]  (%p1345_p7), %s1277_s7, 128, %s1282_s0, %s586_s11  }
 0x303 PF: > { %s611_s30 = sand.u32 1, %s1022_s12   ;;  %p1346_p12 = scmp.ne.s32.totalorder %s1335_s24, 0 }
 0x304   : > { %p1347_p0 = scmp.ge.s32.totalorder %s1034_s15, 2  ;;  %s612_s22 = scalar_lea.sflag [#allocation4], %s611_s30 }
 0x306   : > { %p809_p8 = pnand %p1347_p0, %p1346_p12 }
 0x308   : > { %1017 = dma.done.wait (!%p809_p8), %s612_s22, 128  }
 0x309   : > { %1019 = vsyncadd (!%p809_p8), %s612_s22, 4294967168  ;;  %p19_p10 = scmp.ge.s32.totalorder %s1091_s18, 4   ;;  %s1348_s12 = smov %s1026_s13 }
 0x30a   : > { %s1349_s13 = smov %s1030_s14  ;;  %s1350_s14 = smov %s1103_s21 }
 0x30b   : > { %s1351_s15 = smov %s1091_s18  ;;  %21 = sbr.rel (!%p19_p10) target bundleno = 9 (0x9), region = 101 }
 0x312   :  { %617 = vsyncpa [#allocation3], 1 }
 0x313   :  { %619 = vsyncpa [#allocation3 + $0x1], 1 }
 0x314   :  { %620 = vsyncpa [#allocation6], 1 }
 0x315   :  { %622 = vsyncpa [#allocation6 + $0x1], 1 }
 0x316   :  { %623 = vsyncpa [#allocation4], 1 }
 0x317   :  { %625 = vsyncpa [#allocation4 + $0x1], 1 }

</bundles_post_ra>
